<compile_context>
chip_gen: v6e
topology: v6e:2x2x1
jax: 0.10.0
libtpu: 0.0.40
codegen_flags: <defaults>
</compile_context>

<pallas_src>
import jax
import jax.numpy as jnp
from jax.experimental import pallas as pl
from jax.experimental.pallas import tpu as pltpu


def _make_partials_kernel(tm: int, f: int, num_blocks: int, tail_rows,
                          sub_in_input_dtype: bool):
    """Kernel computing per-block partial sums of (y-x)^2 and y^2.

    tail_rows is None when no block is padded; otherwise it is the number of
    valid rows in the last block (mask applied to that block only).
    """
    needs_mask = tail_rows is not None

    def kernel(x_ref, y_ref, num_ref, den_ref):
        def write(num, den):
            # Broadcast the two scalars over lane-dense (1, 8, 128) output tiles.
            num_ref[...] = jnp.full(num_ref.shape, num, dtype=jnp.float32)
            den_ref[...] = jnp.full(den_ref.shape, den, dtype=jnp.float32)

        def fast_path():
            if sub_in_input_dtype:
                # bf16 subtract (packed VPU on v6e/v7x), one upcast afterwards.
                d = (y_ref[...] - x_ref[...]).astype(jnp.float32)
            else:
                d = y_ref[...].astype(jnp.float32) - x_ref[...].astype(jnp.float32)
            y = y_ref[...].astype(jnp.float32)
            write(jnp.sum(d * d), jnp.sum(y * y))

        if not needs_mask:
            fast_path()
        else:
            is_last = pl.program_id(0) == num_blocks - 1

            @pl.when(jnp.logical_not(is_last))
            def _():
                fast_path()

            @pl.when(is_last)
            def _():
                # Padded tail rows contain unspecified bytes (may upcast to
                # NaN/Inf) -> mask x and y BEFORE subtracting.
                x = x_ref[...].astype(jnp.float32)
                y = y_ref[...].astype(jnp.float32)
                row = jax.lax.broadcasted_iota(jnp.int32, (tm, 1), 0)
                valid = row < tail_rows          # (tm, 1) mask, broadcast by where
                x = jnp.where(valid, x, 0.0)
                y = jnp.where(valid, y, 0.0)
                d = y - x
                write(jnp.sum(d * d), jnp.sum(y * y))

    return kernel


def spectral_convergence_loss(x_mag: jax.Array, y_mag: jax.Array,
                              *, target_block_bytes: int = 8 * 1024 * 1024) -> jax.Array:
    """Pallas TPU implementation of SpectralConvergengeLoss.forward.

    Args:
        x_mag: (B, frames, freq_bins) predicted magnitude spectrogram (f32 or bf16).
        y_mag: (B, frames, freq_bins) ground-truth magnitude spectrogram.
        target_block_bytes: approximate per-input block size in bytes.
    Returns:
        scalar float32 loss.
    """
    assert x_mag.shape == y_mag.shape
    total = x_mag.size
    itemsize = jnp.dtype(x_mag.dtype).itemsize

    # Choose a 2D (rows, cols) view of the flat problem.  Prefer a lane-dense
    # last dim (multiple of 128) when the element count allows it; the op is a
    # pure flat reduction, so the reshape is free layout plumbing.
    F = x_mag.shape[-1]
    N = total // F
    if F % 128 != 0:
        for c in (1024, 512, 256, 128):
            if total % c == 0:
                F, N = c, total // c
                break
    x2 = x_mag.reshape(N, F)
    y2 = y_mag.reshape(N, F)

    # Row tiling: ~target_block_bytes per input buffer, rows a multiple of 8.
    rows_per_block = target_block_bytes // max(1, F * itemsize)
    if rows_per_block < 8:
        rows_per_block = 8  # TODO(synk): add an F tile axis for extremely wide freq dims
    if rows_per_block >= N:
        tm = N                                   # single full-extent block, no padding
    else:
        tm = max(8, (rows_per_block // 8) * 8)   # multiple of 8 (sublane rule)
    num_blocks = pl.cdiv(N, tm)
    rem = N % tm
    tail_rows = rem if rem != 0 else None        # only the last block needs masking

    # Scoped VMEM budget: 2 inputs x 2 pipeline buffers x block + outputs + headroom,
    # capped at ~75% of physical VMEM (48 MiB on v7x, 96 MiB on v5e/v6e).
    block_bytes = tm * F * itemsize
    out_bytes = 2 * 2 * 8 * 128 * 4
    vmem_limit = int(1.25 * (2 * 2 * block_bytes + out_bytes)) + (2 << 20)
    try:
        vmem_cap = int(0.75 * pltpu.get_tpu_info().vmem_capacity_bytes)
    except Exception:
        vmem_cap = 48 << 20
    vmem_cap = max(vmem_cap, 32 << 20)
    vmem_limit = max(4 << 20, min(vmem_limit, vmem_cap))

    kernel = _make_partials_kernel(
        tm, F, num_blocks, tail_rows,
        sub_in_input_dtype=(x2.dtype == jnp.bfloat16 and y2.dtype == jnp.bfloat16),
    )

    out_num, out_den = pl.pallas_call(
        kernel,
        out_shape=(
            jax.ShapeDtypeStruct((num_blocks, 8, 128), jnp.float32),
            jax.ShapeDtypeStruct((num_blocks, 8, 128), jnp.float32),
        ),
        grid_spec=pltpu.PrefetchScalarGridSpec(
            num_scalar_prefetch=0,
            grid=(num_blocks,),
            in_specs=[
                pl.BlockSpec((tm, F), lambda i: (i, 0)),
                pl.BlockSpec((tm, F), lambda i: (i, 0)),
            ],
            out_specs=[
                pl.BlockSpec((1, 8, 128), lambda i: (i, 0, 0)),
                pl.BlockSpec((1, 8, 128), lambda i: (i, 0, 0)),
            ],
        ),
        compiler_params=pltpu.CompilerParams(
            dimension_semantics=("parallel",),   # independent partials -> both TCs on v7x
            vmem_limit_bytes=vmem_limit,
        ),
    )(x2, y2)

    num = jnp.sum(out_num[:, 0, 0])
    den = jnp.sum(out_den[:, 0, 0])
    # Matches torch.norm semantics: no eps, ||y||_F == 0 -> inf/nan.
    return jnp.sqrt(num) / jnp.sqrt(den)


def _ref_loss(x, y):
    xf = x.astype(jnp.float32)
    yf = y.astype(jnp.float32)
    return jnp.linalg.norm((yf - xf).ravel()) / jnp.linalg.norm(yf.ravel())


if __name__ == "__main__":
    key = jax.random.PRNGKey(0)
    kx, ky = jax.random.split(key)

    # Primary test: (B, #frames, #freq_bins) magnitude spectrograms, F % 128 == 0.
    B, T, F = 2, 16, 128
    x_mag = jnp.abs(jax.random.normal(kx, (B, T, F), dtype=jnp.float32))
    y_mag = jnp.abs(jax.random.normal(ky, (B, T, F), dtype=jnp.float32))
    loss = jax.block_until_ready(spectral_convergence_loss(x_mag, y_mag))
    ref = _ref_loss(x_mag, y_mag)
    assert jnp.allclose(loss, ref, rtol=1e-5, atol=1e-6), (loss, ref)

    # Non-aligned shape (F not a multiple of 128, rows not a multiple of 8,
    # total not divisible by 128 -> (N, F) fallback, single full-extent block).
    B2, T2, F2 = 2, 7, 80
    xb = jnp.abs(jax.random.normal(kx, (B2, T2, F2), dtype=jnp.float32))
    yb = jnp.abs(jax.random.normal(ky, (B2, T2, F2), dtype=jnp.float32))
    loss2 = jax.block_until_ready(spectral_convergence_loss(xb, yb))
    ref2 = _ref_loss(xb, yb)
    assert jnp.allclose(loss2, ref2, rtol=1e-5, atol=1e-6), (loss2, ref2)

    # Force multiple row tiles with a ragged tail to exercise the gated in-kernel
    # mask (N=14 rows, tm=8 -> 2 blocks, last block has 6 valid rows).
    loss3 = jax.block_until_ready(
        spectral_convergence_loss(xb, yb, target_block_bytes=8 * F2 * 4))
    assert jnp.allclose(loss3, ref2, rtol=1e-5, atol=1e-6), (loss3, ref2)

    # Lane-dense re-tiling path: F=96 not a multiple of 128, but total=12288 is
    # divisible by 1024 -> flat (12, 1024) view; small block forces 2 tiles with
    # a masked tail (8 + 4 rows).
    B3, T3, F3 = 2, 64, 96
    xc = jnp.abs(jax.random.normal(kx, (B3, T3, F3), dtype=jnp.float32))
    yc = jnp.abs(jax.random.normal(ky, (B3, T3, F3), dtype=jnp.float32))
    ref4 = _ref_loss(xc, yc)
    loss4 = jax.block_until_ready(spectral_convergence_loss(xc, yc))
    assert jnp.allclose(loss4, ref4, rtol=1e-5, atol=1e-6), (loss4, ref4)
    loss5 = jax.block_until_ready(
        spectral_convergence_loss(xc, yc, target_block_bytes=8 * 1024 * 4))
    assert jnp.allclose(loss5, ref4, rtol=1e-5, atol=1e-6), (loss5, ref4)

    # bf16 inputs: subtraction at input width, f32 accumulation.
    xh = x_mag.astype(jnp.bfloat16)
    yh = y_mag.astype(jnp.bfloat16)
    loss6 = jax.block_until_ready(spectral_convergence_loss(xh, yh))
    ref6 = _ref_loss(xh, yh)
    assert jnp.allclose(loss6, ref6, rtol=2e-2, atol=1e-3), (loss6, ref6)

    print("KERNEL_OK")
</pallas_src>

<mosaic_0001>
module attributes {stable_mosaic.version = 11 : i64} {
  func.func @kernel(%arg0: i32, %arg1: memref<32x128xf32, #tpu.memory_space<vmem>>, %arg2: memref<32x128xf32, #tpu.memory_space<vmem>>, %arg3: memref<1x8x128xf32, #tpu.memory_space<vmem>>, %arg4: memref<1x8x128xf32, #tpu.memory_space<vmem>>) attributes {dimension_semantics = [#tpu.dimension_semantics<parallel>], iteration_bounds = array<i64: 1>, scalar_prefetch = 0 : i64, scratch_operands = 0 : i64, tpu.core_type = #tpu.core_type<tc>, window_params = [{transform_indices = @transform_0, window_bounds = array<i64: 32, 128>}, {transform_indices = @transform_1, window_bounds = array<i64: 32, 128>}, {transform_indices = @transform_2, window_bounds = array<i64: 1, 8, 128>}, {transform_indices = @transform_3, window_bounds = array<i64: 1, 8, 128>}]} {
    %c0 = arith.constant 0 : index
    %c0_0 = arith.constant 0 : index
    %0 = vector.load %arg2[%c0, %c0_0] : memref<32x128xf32, #tpu.memory_space<vmem>>, vector<32x128xf32>
    %c0_1 = arith.constant 0 : index
    %c0_2 = arith.constant 0 : index
    %1 = vector.load %arg1[%c0_1, %c0_2] : memref<32x128xf32, #tpu.memory_space<vmem>>, vector<32x128xf32>
    %2 = arith.subf %0, %1 : vector<32x128xf32>
    %c0_3 = arith.constant 0 : index
    %c0_4 = arith.constant 0 : index
    %3 = vector.load %arg2[%c0_3, %c0_4] : memref<32x128xf32, #tpu.memory_space<vmem>>, vector<32x128xf32>
    %4 = arith.mulf %2, %2 : vector<32x128xf32>
    %5 = vector.shape_cast %4 : vector<32x128xf32> to vector<1x32x128xf32>
    %cst = arith.constant dense<0.000000e+00> : vector<1xf32>
    %6 = vector.multi_reduction <add>, %5, %cst [1, 2] : vector<1x32x128xf32> to vector<1xf32>
    %7 = vector.shape_cast %6 : vector<1xf32> to vector<1x1x1xf32>
    %8 = vector.extract %7[0, 0, 0] : f32 from vector<1x1x1xf32>
    %9 = arith.mulf %3, %3 : vector<32x128xf32>
    %10 = vector.shape_cast %9 : vector<32x128xf32> to vector<1x32x128xf32>
    %cst_5 = arith.constant dense<0.000000e+00> : vector<1xf32>
    %11 = vector.multi_reduction <add>, %10, %cst_5 [1, 2] : vector<1x32x128xf32> to vector<1xf32>
    %12 = vector.shape_cast %11 : vector<1xf32> to vector<1x1x1xf32>
    %13 = vector.extract %12[0, 0, 0] : f32 from vector<1x1x1xf32>
    %14 = vector.broadcast %8 : f32 to vector<1x8x128xf32>
    %c0_6 = arith.constant 0 : index
    %c0_7 = arith.constant 0 : index
    %c0_8 = arith.constant 0 : index
    %15 = vector.load %arg3[%c0_6, %c0_7, %c0_8] : memref<1x8x128xf32, #tpu.memory_space<vmem>>, vector<1x8x128xf32>
    tpu.vector_store %arg3[%c0_6, %c0_7, %c0_8], %14 {strides = array<i32>} : memref<1x8x128xf32, #tpu.memory_space<vmem>>, vector<1x8x128xf32>,
    %16 = vector.broadcast %13 : f32 to vector<1x8x128xf32>
    %c0_9 = arith.constant 0 : index
    %c0_10 = arith.constant 0 : index
    %c0_11 = arith.constant 0 : index
    %17 = vector.load %arg4[%c0_9, %c0_10, %c0_11] : memref<1x8x128xf32, #tpu.memory_space<vmem>>, vector<1x8x128xf32>
    tpu.vector_store %arg4[%c0_9, %c0_10, %c0_11], %16 {strides = array<i32>} : memref<1x8x128xf32, #tpu.memory_space<vmem>>, vector<1x8x128xf32>,
    return
  }
  func.func @transform_0(%arg0: i32) -> (i32, i32) {
    %c0_i32 = arith.constant 0 : i32
    %c0_i32_0 = arith.constant 0 : i32
    return %arg0, %c0_i32 : i32, i32
  }
  func.func @transform_1(%arg0: i32) -> (i32, i32) {
    %c0_i32 = arith.constant 0 : i32
    %c0_i32_0 = arith.constant 0 : i32
    return %arg0, %c0_i32 : i32, i32
  }
  func.func @transform_2(%arg0: i32) -> (i32, i32, i32) {
    %c0_i32 = arith.constant 0 : i32
    %c0_i32_0 = arith.constant 0 : i32
    %c0_i32_1 = arith.constant 0 : i32
    return %arg0, %c0_i32, %c0_i32_0 : i32, i32, i32
  }
  func.func @transform_3(%arg0: i32) -> (i32, i32, i32) {
    %c0_i32 = arith.constant 0 : i32
    %c0_i32_0 = arith.constant 0 : i32
    %c0_i32_1 = arith.constant 0 : i32
    return %arg0, %c0_i32, %c0_i32_0 : i32, i32, i32
  }
}

</mosaic_0001>

<bundles_post_ra>
// kernel: tpu_custom_call.1
= control target key start
LH: loop header
LB: loop body
LE: loop exit
PB: predicated region body
PF: predicated region fallthrough
CT: control target
= control target key end

     0   :  { %9 = vsyncpa [#allocation3], 0  ;;  %s257_s0 = inlined_call_operand.hbm [shape: f32[32,128], index: 0, kind: input, shape index: {}]   ;;  %s258_s1 = inlined_call_operand.hbm [shape: f32[32,128], index: 1, kind: input, shape index: {}]   ;;  %s259_s2 = inlined_call_operand.hbm [shape: f32[1,8,128], index: 2, kind: output, shape index: {0}]   ;;  %s260_s3 = inlined_call_operand.hbm [shape: f32[1,8,128], index: 3, kind: output, shape index: {1}]  }
   0x1   :  { %10 = vsyncpa [#allocation6], 0 }
   0x2   :  { %11 = vsyncpa [#allocation4], 0 }
   0x3   :  { %12 = vsyncpa [#allocation9], 0  ;;  %s219_s12 = smov [#allocation2]  }
   0x4   :  { %s18_s13 = sshll.u32 %s219_s12, 4  ;;  %s19_s13 = int_to_ptr.vmem [resolvable:$true] %s18_s13 }
   0x5   :  { %s139_s14 = scalar_lea.vmem %s19_s13, 512  ;;  %p144_p1 = scmp.lt.s32.totalorder %s19_s13, %s19_s13 }
   0x6   :  { %p140_p0 = scmp.ne.s32.totalorder %s19_s13, %s139_s14  ;;  %p145_p2 = scmp.lt.s32.totalorder %s139_s14, %s139_s14 }
   0x8   :  { %p146_p3 = por %p145_p2, %p144_p1 }
   0xa   :  { %p147_p4 = pnand %p146_p3, %p140_p0 }
   0xc   :  { %150 = shalt.err (!%p147_p4)
}
   0xd   :  { %s220_s15 = smov 128   ;;  %s221_s16 = smov 8  }
   0xe   :  { %24 = dma.hbm_to_vmem [thread:$0]  %s257_s0, 512, %s19_s13, [#allocation3], %s220_s15, %s220_s15, %s221_s16  }
   0xf   :  { %s222_s19 = smov [#allocation5]  }
  0x10   :  { %s30_s20 = sshll.u32 %s222_s19, 4  ;;  %s31_s20 = int_to_ptr.vmem [resolvable:$true] %s30_s20 }
  0x11   :  { %s159_s21 = scalar_lea.vmem %s31_s20, 512  ;;  %p164_p6 = scmp.lt.s32.totalorder %s31_s20, %s31_s20 }
  0x12   :  { %p160_p5 = scmp.ne.s32.totalorder %s31_s20, %s159_s21  ;;  %p165_p7 = scmp.lt.s32.totalorder %s159_s21, %s159_s21 }
  0x14   :  { %p166_p8 = por %p165_p7, %p164_p6 }
  0x16   :  { %p167_p9 = pnand %p166_p8, %p160_p5 }
  0x18   :  { %170 = shalt.err (!%p167_p9)
}
  0x19   :  { %36 = dma.hbm_to_vmem [thread:$0]  %s258_s1, 512, %s31_s20, [#allocation6], %s220_s15, %s220_s15, %s221_s16  }
  0x1a   :  { %211 = dma.done.wait [#allocation3], 512  }
  0x1b   :  { %212 = vsyncadd [#allocation3], 4294966784 }
  0x1c   :  { %213 = dma.done.wait [#allocation6], 512  }
  0x1d   :  { %214 = vsyncadd [#allocation6], 4294966784  ;;  %v43_v0 = vld [vmem:[#allocation5] sm:$0xff]  ;;  %v44_v1 = vld [vmem:[#allocation5 + $0x8] sm:$0xff]  ;;  %s223_s0 = smov [#allocation7]   ;;  %s224_s25 = smov [#allocation8]  }
  0x1e   :  { %v45_v2 = vld [vmem:[#allocation5 + $0x10] sm:$0xff]  ;;  %v46_v3 = vld [vmem:[#allocation5 + $0x18] sm:$0xff]  ;;  %v47_v4 = vld [vmem:[#allocation2] sm:$0xff]  ;;  %v71_v6 = vmul.f32 %v43_v0, %v43_v0  ;;  %v72_v7 = vmul.f32 %v44_v1, %v44_v1  ;;  %s97_s1 = sshll.u32 %s223_s0, 4  ;;  %s107_s26 = sshll.u32 %s224_s25, 4  ;;  %s98_s1 = int_to_ptr.vmem [resolvable:$true] %s97_s1  ;;  %s108_s26 = int_to_ptr.vmem [resolvable:$true] %s107_s26 }
  0x1f   :  { %v48_v5 = vld [vmem:[#allocation2 + $0x8] sm:$0xff]  ;;  %v49_v8 = vld [vmem:[#allocation2 + $0x10] sm:$0xff]  ;;  %v50_v9 = vld [vmem:[#allocation2 + $0x18] sm:$0xff]  ;;  %v51_v10 = vsub.f32 %v43_v0, %v47_v4  ;;  %v73_v16 = vmul.f32 %v45_v2, %v45_v2  ;;  %v74_v22 = vmul.f32 %v46_v3, %v46_v3  ;;  %s171_s27 = scalar_lea.vmem %s98_s1, 128  ;;  %p176_p11 = scmp.lt.s32.totalorder %s98_s1, %s98_s1 }
  0x20   :  { %v52_v11 = vsub.f32 %v44_v1, %v48_v5  ;;  %v53_v12 = vsub.f32 %v45_v2, %v49_v8  ;;  %v54_v13 = vsub.f32 %v46_v3, %v50_v9  ;;  %v75_v17 = vadd.f32 %v72_v7, %v71_v6  ;;  %p172_p10 = scmp.ne.s32.totalorder %s98_s1, %s171_s27  ;;  %p177_p12 = scmp.lt.s32.totalorder %s171_s27, %s171_s27 }
  0x21   :  { %v55_v14 = vmul.f32 %v51_v10, %v51_v10 }
  0x22   :  { %v56_v15 = vmul.f32 %v52_v11, %v52_v11  ;;  %v57_v18 = vmul.f32 %v53_v12, %v53_v12  ;;  %v58_v19 = vmul.f32 %v54_v13, %v54_v13  ;;  %v76_v23 = vadd.f32 %v75_v17, %v73_v16  ;;  %p178_p13 = por %p177_p12, %p176_p11 }
  0x24   :  { %v59_v20 = vadd.f32 %v56_v15, %v55_v14  ;;  %v77_v25 = vadd.f32 %v76_v23, %v74_v22  ;;  %p179_p0 = pnand %p178_p13, %p172_p10 }
  0x26   :  { %v60_v21 = vadd.f32 %v59_v20, %v57_v18 }
  0x28   :  { %v61_v24 = vadd.f32 %v60_v21, %v58_v19 }
  0x2a   :  { %62 = vadd.xlane.f32.xlu0 %v61_v24 }
  0x2e   :  { %78 = vadd.xlane.f32.xlu0 %v77_v25 }
  0xb3   :  { %v63_v26 = vpop.xlane.xlu0 %62 }
  0xb4   :  { %v64_v27 = vrot.slane %v63_v26, 4 }
  0xb6   :  { %v65_v28 = vadd.f32 %v64_v27, %v63_v26 }
  0xb7   :  { %v79_v29 = vpop.xlane.xlu0 %78 }
  0xb8   :  { %v66_v30 = vrot.slane %v65_v28, 2  ;;  %v80_v31 = vrot.slane %v79_v29, 4 }
  0xba   :  { %v81_v32 = vadd.f32 %v80_v31, %v79_v29  ;;  %v67_v33 = vadd.f32 %v66_v30, %v65_v28 }
  0xbc   :  { %v82_v34 = vrot.slane %v81_v32, 2  ;;  %v68_v35 = vrot.slane %v67_v33, 1 }
  0xbe   :  { %v83_v36 = vadd.f32 %v82_v34, %v81_v32  ;;  %v69_v37 = vadd.f32 %v68_v35, %v67_v33 }
  0xc0   :  { %121 = vpush %v69_v37  ;;  %v84_v38 = vrot.slane %v83_v36, 1 }
  0xc2   :  { %v85_v39 = vadd.f32 %v84_v38, %v83_v36 }
  0xc4   :  { %123 = vpush %v85_v39 }
  0xf1   :  { %s122_s24 = spop %121 }
  0xf2   :  { %v87_v40 = vstv %s122_s24 }
  0xf3   :  { %88 = vst [vmem:[#allocation7] sm:$0xff] %v87_v40 }
  0xf4   :  { %182 = shalt.err (!%p179_p0)
}
  0xf5   :  { %100 = dma.vmem_to_hbm [thread:$0]  %s98_s1, 128, %s259_s2, [#allocation4]  }
  0xf6   :  { %s124_s30 = spop %123  ;;  %s191_s4 = scalar_lea.vmem %s108_s26, 128 }
  0xf7   :  { %v89_v41 = vstv %s124_s30  ;;  %p192_p1 = scmp.ne.s32.totalorder %s108_s26, %s191_s4  ;;  %p196_p2 = scmp.lt.s32.totalorder %s108_s26, %s108_s26 }
  0xf8   :  { %90 = vst [vmem:[#allocation8] sm:$0xff] %v89_v41  ;;  %p197_p3 = scmp.lt.s32.totalorder %s191_s4, %s191_s4 }
  0xfa   :  { %p198_p4 = por %p197_p3, %p196_p2 }
  0xfc   :  { %p199_p5 = pnand %p198_p4, %p192_p1 }
  0xfe   :  { %202 = shalt.err (!%p199_p5)
}
  0xff   :  { %110 = dma.vmem_to_hbm [thread:$0]  %s108_s26, 128, %s260_s3, [#allocation9]  }
 0x100   :  { %215 = dma.done.wait [#allocation4], 128  }
 0x101   :  { %216 = vsyncadd [#allocation4], 4294967168 }
 0x102   :  { %217 = dma.done.wait [#allocation9], 128  }
 0x103   :  { %218 = vsyncadd [#allocation9], 4294967168 }
 0x104   :  { %117 = vsyncpa [#allocation3], 1 }
 0x105   :  { %118 = vsyncpa [#allocation6], 1 }
 0x106   :  { %119 = vsyncpa [#allocation4], 1 }
 0x107   :  { %120 = vsyncpa [#allocation9], 1 }

</bundles_post_ra>
